<compile_context>
chip_gen: v7x
topology: tpu7x:2x2x1
jax: 0.10.0
libtpu: 0.0.40
codegen_flags: <defaults>
</compile_context>

<pallas_src>
import numpy as np
import jax
import jax.numpy as jnp
from jax.experimental import pallas as pl
from jax.experimental.pallas import tpu as pltpu


def _copy_kernel(x_ref, o_ref):
    # Identity copy: input and output tiles have identical shape/layout, so
    # there is no in-kernel relayout — just full-width loads and stores.
    o_ref[...] = x_ref[...]


def _resolve_size(size, total):
    """Resolve a single -1 entry like torch.reshape does."""
    size = tuple(int(s) for s in size)
    if -1 in size:
        neg_idx = size.index(-1)
        known = 1
        for i, s in enumerate(size):
            if i != neg_idx:
                known *= s
        assert known > 0 and total % known == 0, "invalid reshape size"
        size = size[:neg_idx] + (total // known,) + size[neg_idx + 1:]
    prod = 1
    for s in size:
        prod *= s
    assert prod == total, "reshape size does not match number of elements"
    return size


def _pick_lane_width(total):
    """Largest multiple-of-128 lane width that evenly divides `total`."""
    for lane in (2048, 1024, 512, 384, 256, 128):
        if total % lane == 0:
            return lane
    return None


class ReshapeLayer:
    """JAX/Pallas equivalent of the PyTorch ReshapeLayer module."""

    # Target ~4 MiB tiles: with in+out each double-buffered that is ~16 MiB
    # resident, safe under default scoped VMEM on v5e/v6e/v7x.
    _TARGET_TILE_BYTES = 4 * 1024 * 1024

    def __init__(self, size):
        self.size = tuple(size)

    def __call__(self, x):
        total = int(np.prod(x.shape)) if x.ndim > 0 else 1
        out_size = _resolve_size(self.size, total)
        itemsize = np.dtype(x.dtype).itemsize

        lane = _pick_lane_width(total)
        if lane is None:
            # Total element count not a multiple of 128: fall back to a single
            # full-array block on a flat [1, total] view (block == full array
            # dims, so the (8,128) rule does not apply).
            flat_shape = (1, total)
        else:
            flat_shape = (total // lane, lane)

        # Metadata-only reshape to the canonical lane-dense 2D view.
        x2 = jnp.reshape(x, flat_shape)
        rows, lane_w = flat_shape

        # Row-tile size: big enough to amortize per-step overhead, small
        # enough for double-buffered VMEM residency on all generations.
        tm = max(1, self._TARGET_TILE_BYTES // max(1, lane_w * itemsize))
        if tm >= rows:
            tm = rows                      # full dim -> always a legal block
        else:
            tm = max(8, (tm // 8) * 8)     # keep sublane dim a multiple of 8

        grid = (pl.cdiv(rows, tm),)
        spec = pl.BlockSpec((tm, lane_w), lambda i: (i, 0))

        flat_out = pl.pallas_call(
            _copy_kernel,
            out_shape=jax.ShapeDtypeStruct(flat_shape, x.dtype),
            grid=grid,
            in_specs=[spec],
            out_specs=spec,
            compiler_params=pltpu.CompilerParams(
                dimension_semantics=("parallel",)),
            cost_estimate=pl.CostEstimate(
                flops=0,
                transcendentals=0,
                bytes_accessed=2 * total * itemsize),
        )(x2)

        # Metadata-only reshape to the requested output size.
        return jnp.reshape(flat_out, out_size)

    def string(self):
        return "ReshapeLayer: " + str(self.size)


if __name__ == "__main__":
    key = jax.random.PRNGKey(0)

    # Small NCHW activation: batch=2, channels=4, spatial=16x16 -> 2048 elems.
    x = jax.random.normal(key, (2, 4, 16, 16), dtype=jnp.float32)

    # Flatten spatial dims.
    layer = ReshapeLayer((2, 4, 256))
    out = jax.block_until_ready(layer(x))
    ref = jnp.reshape(x, (2, 4, 256))
    assert out.shape == ref.shape and out.dtype == ref.dtype
    np.testing.assert_array_equal(np.asarray(out), np.asarray(ref))

    # -1 size, like PyTorch allows.
    layer2 = ReshapeLayer((2, -1))
    out2 = jax.block_until_ready(layer2(x))
    np.testing.assert_array_equal(np.asarray(out2),
                                  np.asarray(jnp.reshape(x, (2, -1))))

    # Odd element count (105) exercises the full-array fallback path.
    x3 = jax.random.normal(key, (3, 5, 7), dtype=jnp.float32)
    layer3 = ReshapeLayer((7, 15))
    out3 = jax.block_until_ready(layer3(x3))
    np.testing.assert_array_equal(np.asarray(out3),
                                  np.asarray(jnp.reshape(x3, (7, 15))))

    print("KERNEL_OK")
</pallas_src>

<mosaic_0001>
module attributes {stable_mosaic.version = 11 : i64} {
  func.func @_copy_kernel(%arg0: i32, %arg1: memref<1x2048xf32, #tpu.memory_space<vmem>>, %arg2: memref<1x2048xf32, #tpu.memory_space<vmem>>) attributes {dimension_semantics = [#tpu.dimension_semantics<parallel>], iteration_bounds = array<i64: 1>, scalar_prefetch = 0 : i64, scratch_operands = 0 : i64, tpu.core_type = #tpu.core_type<tc>, window_params = [{transform_indices = @transform_0, window_bounds = array<i64: 1, 2048>}, {transform_indices = @transform_1, window_bounds = array<i64: 1, 2048>}]} {
    %c0 = arith.constant 0 : index
    %c0_0 = arith.constant 0 : index
    %0 = vector.load %arg1[%c0, %c0_0] : memref<1x2048xf32, #tpu.memory_space<vmem>>, vector<1x2048xf32>
    %c0_1 = arith.constant 0 : index
    %c0_2 = arith.constant 0 : index
    %1 = vector.load %arg2[%c0_1, %c0_2] : memref<1x2048xf32, #tpu.memory_space<vmem>>, vector<1x2048xf32>
    tpu.vector_store %arg2[%c0_1, %c0_2], %0 {strides = array<i32>} : memref<1x2048xf32, #tpu.memory_space<vmem>>, vector<1x2048xf32>,
    return
  }
  func.func @transform_0(%arg0: i32) -> (i32, i32) {
    %c0_i32 = arith.constant 0 : i32
    %c0_i32_0 = arith.constant 0 : i32
    return %arg0, %c0_i32 : i32, i32
  }
  func.func @transform_1(%arg0: i32) -> (i32, i32) {
    %c0_i32 = arith.constant 0 : i32
    %c0_i32_0 = arith.constant 0 : i32
    return %arg0, %c0_i32 : i32, i32
  }
}

</mosaic_0001>

<bundles_post_ra>
// kernel: tpu_custom_call.1
= control target key start
LH: loop header
LB: loop body
LE: loop exit
PB: predicated region body
PF: predicated region fallthrough
CT: control target
= control target key end

     0   :  { %6 = vsyncpa [#allocation3], 0  ;;  %s126_s0 = inlined_call_operand.hbm [shape: f32[1,2048], index: 0, kind: input, shape index: {}]   ;;  %s127_s1 = inlined_call_operand.hbm [shape: f32[1,2048], index: 1, kind: output, shape index: {}]  }
   0x1   :  { %7 = vsyncpa [#allocation4], 0  ;;  %s90_s6 = smov [#allocation2]   ;;  %s42_s10 = scalar_lea.hbm %s126_s0, 256 }
   0x2   :  { %s14_s7 = sshll.u32 %s90_s6, 4  ;;  %p43_p0 = scmp.ne.s32.totalorder %s126_s0, %s42_s10  ;;  %s15_s7 = int_to_ptr.vmem [resolvable:$true] %s14_s7 }
   0x3   :  { %p46_p1 = scmp.lt.u32.totalorder %s42_s10, %s126_s0 }
   0x5   :  { %p48_p2 = pnand %p46_p1, %p43_p0 }
   0x7   :  { %51 = shalt.err (!%p48_p2)
}
   0x8   :  { %s52_s15 = scalar_lea.vmem %s15_s7, 256  ;;  %p57_p4 = scmp.lt.s32.totalorder %s15_s7, %s15_s7 }
   0x9   :  { %p53_p3 = scmp.ne.s32.totalorder %s15_s7, %s52_s15  ;;  %p58_p5 = scmp.lt.s32.totalorder %s52_s15, %s52_s15 }
   0xb   :  { %p59_p6 = por %p58_p5, %p57_p4 }
   0xd   :  { %p60_p7 = pnand %p59_p6, %p53_p3 }
   0xf   :  { %63 = shalt.err (!%p60_p7)
}
  0x10   :  { %17 = dma.hbm_to_vmem [thread:$0]  %s126_s0, 256, %s15_s7, [#allocation3]  }
  0x11   :  { %86 = dma.done.wait [#allocation3], 256  }
  0x12   :  { %87 = vsyncadd [#allocation3], 4294967040  ;;  %s91_s18 = smov [#allocation5]   ;;  %v21_v0 = vld [vmem:[#allocation2] sm:$0xff]  ;;  %v22_v1 = vld [vmem:[#allocation2 + $0x8] sm:$0xff] }
  0x13   :  { %s31_s19 = sshll.u32 %s91_s18, 4  ;;  %23 = vst [vmem:[#allocation5] sm:$0xff] %v21_v0  ;;  %24 = vst [vmem:[#allocation5 + $0x8] sm:$0xff] %v22_v1  ;;  %s32_s19 = int_to_ptr.vmem [resolvable:$true] %s31_s19 }
  0x14   :  { %s64_s20 = scalar_lea.vmem %s32_s19, 256  ;;  %p69_p9 = scmp.lt.s32.totalorder %s32_s19, %s32_s19 }
  0x15   :  { %p65_p8 = scmp.ne.s32.totalorder %s32_s19, %s64_s20  ;;  %p70_p10 = scmp.lt.s32.totalorder %s64_s20, %s64_s20 }
  0x17   :  { %p71_p11 = por %p70_p10, %p69_p9 }
  0x19   :  { %p72_p12 = pnand %p71_p11, %p65_p8 }
  0x1b   :  { %75 = shalt.err (!%p72_p12)
}
  0x1c   :  { %s76_s0 = scalar_lea.hbm %s127_s1, 256 }
  0x1d   :  { %p77_p13 = scmp.ne.s32.totalorder %s127_s1, %s76_s0  ;;  %p80_p0 = scmp.lt.u32.totalorder %s76_s0, %s127_s1 }
  0x1f   :  { %p82_p1 = pnand %p80_p0, %p77_p13 }
  0x21   :  { %85 = shalt.err (!%p82_p1)
}
  0x22   :  { %34 = dma.vmem_to_hbm [thread:$0]  %s32_s19, 256, %s127_s1, [#allocation4]  }
  0x23   :  { %88 = dma.done.wait [#allocation4], 256  }
  0x24   :  { %89 = vsyncadd [#allocation4], 4294967040 }
  0x25   :  { %38 = vsyncpa [#allocation3], 1 }
  0x26   :  { %39 = vsyncpa [#allocation4], 1 }

</bundles_post_ra>
